<compile_context>
chip_gen: v7x
topology: tpu7x:2x2x1
jax: 0.10.0
libtpu: 0.0.40
codegen_flags: <defaults>
</compile_context>

<pallas_src>
import functools
import itertools
import math

import numpy as np
import jax
import jax.numpy as jnp
from jax.experimental import pallas as pl
from jax.experimental.pallas import tpu as pltpu


# -----------------------------------------------------------------------------
# Config (mirrors the module's __init__ hyperparameters)
# -----------------------------------------------------------------------------
CONFIG = dict(
    num_samples=2,          # -> num_spectra = 2 + C(2,2) = 3
    num_zbins=2,            # -> num_channels = num_zbins * num_spectra = 6
    num_cosmo_params=4,
    num_bias_params=2,
    num_kbins=16,
    num_ells=2,             # -> output_dim = num_kbins * num_ells = 32
    mlp_dims=[32, 32],
    num_mlp_blocks=1,
    num_block_layers=1,
    use_skip_connection=True,
)


def derived(cfg):
    num_spectra = cfg["num_samples"] + math.comb(cfg["num_samples"], 2)
    num_channels = cfg["num_zbins"] * num_spectra
    output_dim = cfg["num_kbins"] * cfg["num_ells"]
    in_dim = cfg["num_cosmo_params"] + 2 * cfg["num_bias_params"]
    return num_spectra, num_channels, output_dim, in_dim


def _round_up(x, m):
    return ((x + m - 1) // m) * m


def _sigmoid(x):
    return 1.0 / (1.0 + jnp.exp(-x))


# -----------------------------------------------------------------------------
# Fused Pallas kernel: whole MLP forward for one batch tile
# -----------------------------------------------------------------------------
def _fused_mlp_kernel(*refs, block_descs, use_skip):
    """refs = (x_ref, w_0, ..., w_{L-1}, bias_stack_ref, o_ref).

    Weights are block-diagonal (channel-folded), zero-padded to lane-dense
    widths, in matmul dtype (bf16 by default); biases are one f32 stack.
    All activations stay on-chip (VMEM/vregs) between layers.
    """
    x_ref = refs[0]
    o_ref = refs[-1]
    b_ref = refs[-2]
    w_refs = refs[1:-2]

    b_all = b_ref[...]                         # (L_pad, dout_max) f32, tiny

    counter = {"i": 0}

    def linear(h, relu):
        i = counter["i"]
        counter["i"] = i + 1
        w = w_refs[i][...]                     # (din_p, dout_p)
        dout = w.shape[1]
        z = jnp.dot(h.astype(w.dtype), w, preferred_element_type=jnp.float32)
        z = z + b_all[i:i + 1, :dout]          # f32 bias, broadcast over rows
        return jnp.maximum(z, 0.0) if relu else z

    # h1 + ReLU
    h = linear(x_ref[...], relu=True)

    # parallel-resnet blocks (outer F.relu from forward() fused in)
    for num_hidden, has_proj in block_descs:
        x_in = h
        y = h
        for _ in range(num_hidden):
            y = linear(y, relu=True)
        out = linear(y, relu=False)
        if use_skip:
            out = out + (linear(x_in, relu=False) if has_proj else x_in)
        h = jnp.maximum(out, 0.0)

    # h2 + sigmoid
    z = linear(h, relu=False)
    o_ref[...] = _sigmoid(z).astype(o_ref.dtype)


# -----------------------------------------------------------------------------
# Host-side, one-time parameter packing
#   per-channel (C, Din, Dout) -> block-diagonal (C*Din_p, C*Dout_p), bf16
#   all biases -> one (L_pad, Dout_max) f32 stack
# -----------------------------------------------------------------------------
def pack_params(cfg, params, matmul_dtype=jnp.bfloat16):
    _, C, _, _ = derived(cfg)
    weights_np, biases_np = [], []

    def add(p):
        w = np.asarray(p["w"], np.float32)     # (C, din, dout)
        b = np.asarray(p["b"], np.float32)     # (C, 1, dout)
        Cw, din, dout = w.shape
        din_p = _round_up(Cw * din, 128)
        dout_p = _round_up(Cw * dout, 128)
        W = np.zeros((din_p, dout_p), np.float32)
        bv = np.zeros((dout_p,), np.float32)
        for c in range(Cw):
            W[c * din:(c + 1) * din, c * dout:(c + 1) * dout] = w[c]
            bv[c * dout:(c + 1) * dout] = b[c, 0]
        weights_np.append(W)
        biases_np.append(bv)

    add(params["h1"])
    block_descs = []
    for blk in params["blocks"]:
        for lyr in blk["hidden"]:
            add(lyr)
        add(blk["out"])
        has_proj = cfg["use_skip_connection"] and (blk["skip"] is not None)
        if has_proj:
            add(blk["skip"])
        block_descs.append((len(blk["hidden"]), has_proj))
    add(params["h2"])

    L = len(weights_np)
    dout_max = max(W.shape[1] for W in weights_np)
    b_stack = np.zeros((_round_up(L, 8), dout_max), np.float32)
    for i, bv in enumerate(biases_np):
        b_stack[i, :bv.shape[0]] = bv

    return dict(
        weights=tuple(jnp.asarray(W, matmul_dtype) for W in weights_np),
        bias_stack=jnp.asarray(b_stack),
        block_descs=tuple(block_descs),
        use_skip=bool(cfg["use_skip_connection"]),
        matmul_dtype=matmul_dtype,
        din0_p=weights_np[0].shape[0],
        dout_last_p=weights_np[-1].shape[1],
    )


# -----------------------------------------------------------------------------
# pallas_call wrapper
# -----------------------------------------------------------------------------
def choose_btile(B):
    # >= 2 grid steps so a 2-TensorCore chip (v7x) keeps both cores busy,
    # multiple of 8 sublanes, capped at 512 rows (overhead amortized, VMEM
    # nowhere near binding), never badly over-padding a small batch.
    half = (B + 1) // 2
    return max(8, min(512, _round_up(half, 8)))


def fused_mlp_pallas(x_org, packed, *, out_cols, btile=None):
    """x_org: (B, C, in_dim) organized input.  Returns (B, C, out_cols // C)."""
    B, C, in_dim = x_org.shape
    din0 = C * in_dim
    din0_p = packed["din0_p"]
    dout_p = packed["dout_last_p"]
    matmul_dtype = packed["matmul_dtype"]
    weights = packed["weights"]
    b_stack = packed["bias_stack"]
    assert din0 <= din0_p, (din0, din0_p)

    if btile is None:
        btile = choose_btile(B)
    Bp = _round_up(max(B, 8), btile)

    # Flatten channels into the lane axis; pad batch + lanes; ship in bf16.
    x = x_org.reshape(B, din0).astype(matmul_dtype)
    x = jnp.pad(x, ((0, Bp - B), (0, din0_p - din0)))

    in_specs = [pl.BlockSpec((btile, din0_p), lambda i: (i, 0))]
    args = [x]
    for W in weights:
        # Constant index_map -> weights fetched once, VMEM-resident across
        # all batch-tile grid steps.
        in_specs.append(pl.BlockSpec(W.shape, lambda i: (0, 0)))
        args.append(W)
    in_specs.append(pl.BlockSpec(b_stack.shape, lambda i: (0, 0)))
    args.append(b_stack)

    kernel = functools.partial(_fused_mlp_kernel,
                               block_descs=packed["block_descs"],
                               use_skip=packed["use_skip"])

    y = pl.pallas_call(
        kernel,
        out_shape=jax.ShapeDtypeStruct((Bp, dout_p), jnp.float32),
        grid=(Bp // btile,),
        in_specs=in_specs,
        out_specs=pl.BlockSpec((btile, dout_p), lambda i: (i, 0)),
        compiler_params=pltpu.CompilerParams(
            dimension_semantics=("parallel",)),
    )(*args)

    return y[:B, :out_cols].reshape(B, C, out_cols // C)


# -----------------------------------------------------------------------------
# organize_params — faithful to the PyTorch loop:
#   channel idx runs over (s1 <= s2) spectra pairs; cosmo params copied,
#   bias params of s1 interleaved into even slots, s2 into odd slots.
# -----------------------------------------------------------------------------
def organize_params(cfg, params):
    num_spectra, num_channels, _, in_dim = derived(cfg)
    nc, nb = cfg["num_cosmo_params"], cfg["num_bias_params"]
    if num_channels == 1:
        return params
    B = params.shape[0]
    rows = []
    for s1, s2 in itertools.product(range(num_spectra), repeat=2):
        if s1 > s2:
            continue
        b1 = params[:, nc + s1 * nb: nc + (s1 + 1) * nb]
        b2 = params[:, nc + s2 * nb: nc + (s2 + 1) * nb]
        inter = jnp.stack([b1, b2], axis=-1).reshape(B, 2 * nb)   # interleave
        rows.append(jnp.concatenate([params[:, :nc], inter], axis=-1))
    # PyTorch writes channel idx 0..num_pairs-1; extra channels (if any) stay 0.
    rows = rows[:num_channels]
    out = jnp.stack(rows, axis=1)                 # (B, min(pairs, C), in_dim)
    if out.shape[1] < num_channels:
        pad = jnp.zeros((B, num_channels - out.shape[1], in_dim), params.dtype)
        out = jnp.concatenate([out, pad], axis=1)
    return out


def un_normalize(x, normalizations):
    if normalizations is None:       # module default
        return x
    lo, hi = normalizations
    return x * (hi - lo) + lo


# -----------------------------------------------------------------------------
# Parameter init (deterministic, synthetic, per-channel layout like PyTorch)
# -----------------------------------------------------------------------------
def _linear_params(key, C, din, dout):
    kw, kb = jax.random.split(key)
    scale = 1.0 / math.sqrt(din)
    w = jax.random.uniform(kw, (C, din, dout), jnp.float32, -scale, scale)
    b = jax.random.uniform(kb, (C, 1, dout), jnp.float32, -scale, scale)
    return {"w": w, "b": b}


def init_params(key, cfg):
    _, C, output_dim, in_dim = derived(cfg)
    mlp_dims = cfg["mlp_dims"]
    params = {}
    key, k1 = jax.random.split(key)
    params["h1"] = _linear_params(k1, C, in_dim, mlp_dims[0])

    params["blocks"] = []
    for i in range(cfg["num_mlp_blocks"]):
        din, dout = mlp_dims[i], mlp_dims[i + 1]
        blk = {"hidden": [], "out": None, "skip": None}
        for _ in range(cfg["num_block_layers"]):
            key, kh = jax.random.split(key)
            blk["hidden"].append(_linear_params(kh, C, din, din))
        key, ko = jax.random.split(key)
        blk["out"] = _linear_params(ko, C, din, dout)
        if cfg["use_skip_connection"] and din != dout:
            key, ks = jax.random.split(key)
            blk["skip"] = _linear_params(ks, C, din, dout)
        params["blocks"].append(blk)

    key, k2 = jax.random.split(key)
    params["h2"] = _linear_params(k2, C, mlp_dims[-1], output_dim)
    return params


# -----------------------------------------------------------------------------
# Forward passes
# -----------------------------------------------------------------------------
def forward_pallas(cfg, packed, X, *, btile=None, output_normalizations=None):
    num_spectra, C, output_dim, _ = derived(cfg)
    Xo = organize_params(cfg, X)                              # (B, C, in_dim)
    y = fused_mlp_pallas(Xo, packed, out_cols=C * output_dim, btile=btile)
    out = y.reshape(-1, cfg["num_zbins"], num_spectra,
                    cfg["num_ells"], cfg["num_kbins"])
    return un_normalize(out, output_normalizations)


def _channel_linear_ref(x, w, b, residual=None, activation="none"):
    # x: (B, C, Din), w: (C, Din, Dout), b: (C, 1, Dout)
    y = jnp.einsum("bci,cio->bco", x, w,
                   precision=jax.lax.Precision.HIGHEST) + jnp.transpose(b, (1, 0, 2))
    if residual is not None:
        y = y + residual
    if activation == "relu":
        y = jnp.maximum(y, 0.0)
    elif activation == "sigmoid":
        y = _sigmoid(y)
    return y


def forward_ref(cfg, params, X, output_normalizations=None):
    """Pure-JAX reference (also the preferred path for tiny batches)."""
    num_spectra, C, output_dim, _ = derived(cfg)
    h = organize_params(cfg, X)
    h = _channel_linear_ref(h, params["h1"]["w"], params["h1"]["b"],
                            activation="relu")
    for blk in params["blocks"]:
        x_in = h
        y = h
        for lyr in blk["hidden"]:
            y = _channel_linear_ref(y, lyr["w"], lyr["b"], activation="relu")
        res = None
        if cfg["use_skip_connection"]:
            res = (_channel_linear_ref(x_in, blk["skip"]["w"], blk["skip"]["b"])
                   if blk["skip"] is not None else x_in)
        h = _channel_linear_ref(y, blk["out"]["w"], blk["out"]["b"],
                                residual=res, activation="relu")
    out = _channel_linear_ref(h, params["h2"]["w"], params["h2"]["b"],
                              activation="sigmoid")
    out = out.reshape(-1, cfg["num_zbins"], num_spectra,
                      cfg["num_ells"], cfg["num_kbins"])
    return un_normalize(out, output_normalizations)


def forward(cfg, params, packed, X, min_pallas_batch=64):
    """Dispatcher: at tiny batches plain XLA beats any Pallas kernel."""
    if X.shape[0] < min_pallas_batch:
        return forward_ref(cfg, params, X)
    return forward_pallas(cfg, packed, X)


# -----------------------------------------------------------------------------
if __name__ == "__main__":
    cfg = CONFIG
    num_spectra, C, output_dim, in_dim = derived(cfg)

    key = jax.random.PRNGKey(0)
    kx, kp = jax.random.split(key)

    batch = 128
    raw_in_dim = cfg["num_cosmo_params"] + num_spectra * cfg["num_bias_params"]
    X = jax.random.normal(kx, (batch, raw_in_dim), jnp.float32)
    params = init_params(kp, cfg)

    # One-time, host-side weight packing (NOT in the per-call path).
    packed = pack_params(cfg, params, matmul_dtype=jnp.bfloat16)

    fwd = jax.jit(functools.partial(forward_pallas, cfg, packed))
    out = jax.block_until_ready(fwd(X))

    ref = jax.block_until_ready(forward_ref(cfg, params, X))

    assert out.shape == (batch, cfg["num_zbins"], num_spectra,
                         cfg["num_ells"], cfg["num_kbins"]), out.shape
    max_err = float(jnp.max(jnp.abs(out - ref)))
    # bf16 matmul operands (f32 accumulation) + sigmoid-bounded outputs.
    assert max_err < 3e-2, max_err

    print("KERNEL_OK")
</pallas_src>

<mosaic_0001>
module attributes {stable_mosaic.version = 11 : i64} {
  func.func @_fused_mlp_kernel(%arg0: i32, %arg1: memref<64x128xbf16, #tpu.memory_space<vmem>>, %arg2: memref<128x256xbf16, #tpu.memory_space<vmem>>, %arg3: memref<256x256xbf16, #tpu.memory_space<vmem>>, %arg4: memref<256x256xbf16, #tpu.memory_space<vmem>>, %arg5: memref<256x256xbf16, #tpu.memory_space<vmem>>, %arg6: memref<8x256xf32, #tpu.memory_space<vmem>>, %arg7: memref<64x256xf32, #tpu.memory_space<vmem>>) attributes {dimension_semantics = [#tpu.dimension_semantics<parallel>], iteration_bounds = array<i64: 2>, scalar_prefetch = 0 : i64, scratch_operands = 0 : i64, tpu.core_type = #tpu.core_type<tc>, window_params = [{transform_indices = @transform_0, window_bounds = array<i64: 64, 128>}, {pipeline_mode = #tpu.pipeline_mode<synchronous>, transform_indices = @transform_1, window_bounds = array<i64: 128, 256>}, {pipeline_mode = #tpu.pipeline_mode<synchronous>, transform_indices = @transform_2, window_bounds = array<i64: 256, 256>}, {pipeline_mode = #tpu.pipeline_mode<synchronous>, transform_indices = @transform_3, window_bounds = array<i64: 256, 256>}, {pipeline_mode = #tpu.pipeline_mode<synchronous>, transform_indices = @transform_4, window_bounds = array<i64: 256, 256>}, {pipeline_mode = #tpu.pipeline_mode<synchronous>, transform_indices = @transform_5, window_bounds = array<i64: 8, 256>}, {transform_indices = @transform_6, window_bounds = array<i64: 64, 256>}]} {
    %c0 = arith.constant 0 : index
    %c0_0 = arith.constant 0 : index
    %0 = vector.load %arg6[%c0, %c0_0] : memref<8x256xf32, #tpu.memory_space<vmem>>, vector<8x256xf32>
    %c0_1 = arith.constant 0 : index
    %c0_2 = arith.constant 0 : index
    %1 = vector.load %arg1[%c0_1, %c0_2] : memref<64x128xbf16, #tpu.memory_space<vmem>>, vector<64x128xbf16>
    %c0_3 = arith.constant 0 : index
    %c0_4 = arith.constant 0 : index
    %2 = vector.load %arg2[%c0_3, %c0_4] : memref<128x256xbf16, #tpu.memory_space<vmem>>, vector<128x256xbf16>
    %cst = arith.constant dense<0.000000e+00> : vector<64x256xf32>
    %3 = tpu.matmul %1, %2, %cst {dimension_numbers = #tpu.dot_dimension_numbers<[1], [0], [0], [1], [0, 0, 1, 1], [], []>} : vector<64x128xbf16>, vector<128x256xbf16>, vector<64x256xf32> -> vector<64x256xf32>
    %4 = vector.extract_strided_slice %0 {offsets = [0, 0], sizes = [1, 256], strides = [1, 1]} : vector<8x256xf32> to vector<1x256xf32>
    %5 = vector.broadcast %4 : vector<1x256xf32> to vector<64x256xf32>
    %6 = arith.addf %3, %5 : vector<64x256xf32>
    %cst_5 = arith.constant 0.000000e+00 : f32
    %7 = vector.broadcast %cst_5 : f32 to vector<64x256xf32>
    %8 = arith.maximumf %6, %7 : vector<64x256xf32>
    %c0_6 = arith.constant 0 : index
    %c0_7 = arith.constant 0 : index
    %9 = vector.load %arg3[%c0_6, %c0_7] : memref<256x256xbf16, #tpu.memory_space<vmem>>, vector<256x256xbf16>
    %10 = arith.truncf %8 : vector<64x256xf32> to vector<64x256xbf16>
    %cst_8 = arith.constant dense<0.000000e+00> : vector<64x256xf32>
    %11 = tpu.matmul %10, %9, %cst_8 {dimension_numbers = #tpu.dot_dimension_numbers<[1], [0], [0], [1], [0, 0, 1, 1], [], []>} : vector<64x256xbf16>, vector<256x256xbf16>, vector<64x256xf32> -> vector<64x256xf32>
    %12 = vector.extract_strided_slice %0 {offsets = [1, 0], sizes = [1, 256], strides = [1, 1]} : vector<8x256xf32> to vector<1x256xf32>
    %13 = vector.broadcast %12 : vector<1x256xf32> to vector<64x256xf32>
    %14 = arith.addf %11, %13 : vector<64x256xf32>
    %cst_9 = arith.constant 0.000000e+00 : f32
    %15 = vector.broadcast %cst_9 : f32 to vector<64x256xf32>
    %16 = arith.maximumf %14, %15 : vector<64x256xf32>
    %c0_10 = arith.constant 0 : index
    %c0_11 = arith.constant 0 : index
    %17 = vector.load %arg4[%c0_10, %c0_11] : memref<256x256xbf16, #tpu.memory_space<vmem>>, vector<256x256xbf16>
    %18 = arith.truncf %16 : vector<64x256xf32> to vector<64x256xbf16>
    %cst_12 = arith.constant dense<0.000000e+00> : vector<64x256xf32>
    %19 = tpu.matmul %18, %17, %cst_12 {dimension_numbers = #tpu.dot_dimension_numbers<[1], [0], [0], [1], [0, 0, 1, 1], [], []>} : vector<64x256xbf16>, vector<256x256xbf16>, vector<64x256xf32> -> vector<64x256xf32>
    %20 = vector.extract_strided_slice %0 {offsets = [2, 0], sizes = [1, 256], strides = [1, 1]} : vector<8x256xf32> to vector<1x256xf32>
    %21 = vector.broadcast %20 : vector<1x256xf32> to vector<64x256xf32>
    %22 = arith.addf %19, %21 : vector<64x256xf32>
    %23 = arith.addf %22, %8 : vector<64x256xf32>
    %cst_13 = arith.constant 0.000000e+00 : f32
    %24 = vector.broadcast %cst_13 : f32 to vector<64x256xf32>
    %25 = arith.maximumf %23, %24 : vector<64x256xf32>
    %c0_14 = arith.constant 0 : index
    %c0_15 = arith.constant 0 : index
    %26 = vector.load %arg5[%c0_14, %c0_15] : memref<256x256xbf16, #tpu.memory_space<vmem>>, vector<256x256xbf16>
    %27 = arith.truncf %25 : vector<64x256xf32> to vector<64x256xbf16>
    %cst_16 = arith.constant dense<0.000000e+00> : vector<64x256xf32>
    %28 = tpu.matmul %27, %26, %cst_16 {dimension_numbers = #tpu.dot_dimension_numbers<[1], [0], [0], [1], [0, 0, 1, 1], [], []>} : vector<64x256xbf16>, vector<256x256xbf16>, vector<64x256xf32> -> vector<64x256xf32>
    %29 = vector.extract_strided_slice %0 {offsets = [3, 0], sizes = [1, 256], strides = [1, 1]} : vector<8x256xf32> to vector<1x256xf32>
    %30 = vector.broadcast %29 : vector<1x256xf32> to vector<64x256xf32>
    %31 = arith.addf %28, %30 : vector<64x256xf32>
    %cst_17 = arith.constant 0.000000e+00 : f32
    %32 = vector.broadcast %cst_17 : f32 to vector<64x256xf32>
    %33 = arith.subf %32, %31 : vector<64x256xf32>
    %34 = math.exp %33 : vector<64x256xf32>
    %cst_18 = arith.constant 1.000000e+00 : f32
    %35 = vector.broadcast %cst_18 : f32 to vector<64x256xf32>
    %36 = arith.addf %35, %34 : vector<64x256xf32>
    %cst_19 = arith.constant 1.000000e+00 : f32
    %37 = vector.broadcast %cst_19 : f32 to vector<64x256xf32>
    %38 = arith.divf %37, %36 : vector<64x256xf32>
    %c0_20 = arith.constant 0 : index
    %c0_21 = arith.constant 0 : index
    %39 = vector.load %arg7[%c0_20, %c0_21] : memref<64x256xf32, #tpu.memory_space<vmem>>, vector<64x256xf32>
    tpu.vector_store %arg7[%c0_20, %c0_21], %38 {strides = array<i32>} : memref<64x256xf32, #tpu.memory_space<vmem>>, vector<64x256xf32>,
    return
  }
  func.func @transform_0(%arg0: i32) -> (i32, i32) {
    %c0_i32 = arith.constant 0 : i32
    %c0_i32_0 = arith.constant 0 : i32
    return %arg0, %c0_i32 : i32, i32
  }
  func.func @transform_1(%arg0: i32) -> (i32, i32) {
    %c0_i32 = arith.constant 0 : i32
    %c0_i32_0 = arith.constant 0 : i32
    %c0_i32_1 = arith.constant 0 : i32
    return %c0_i32, %c0_i32_0 : i32, i32
  }
  func.func @transform_2(%arg0: i32) -> (i32, i32) {
    %c0_i32 = arith.constant 0 : i32
    %c0_i32_0 = arith.constant 0 : i32
    %c0_i32_1 = arith.constant 0 : i32
    return %c0_i32, %c0_i32_0 : i32, i32
  }
  func.func @transform_3(%arg0: i32) -> (i32, i32) {
    %c0_i32 = arith.constant 0 : i32
    %c0_i32_0 = arith.constant 0 : i32
    %c0_i32_1 = arith.constant 0 : i32
    return %c0_i32, %c0_i32_0 : i32, i32
  }
  func.func @transform_4(%arg0: i32) -> (i32, i32) {
    %c0_i32 = arith.constant 0 : i32
    %c0_i32_0 = arith.constant 0 : i32
    %c0_i32_1 = arith.constant 0 : i32
    return %c0_i32, %c0_i32_0 : i32, i32
  }
  func.func @transform_5(%arg0: i32) -> (i32, i32) {
    %c0_i32 = arith.constant 0 : i32
    %c0_i32_0 = arith.constant 0 : i32
    %c0_i32_1 = arith.constant 0 : i32
    return %c0_i32, %c0_i32_0 : i32, i32
  }
  func.func @transform_6(%arg0: i32) -> (i32, i32) {
    %c0_i32 = arith.constant 0 : i32
    %c0_i32_0 = arith.constant 0 : i32
    return %arg0, %c0_i32 : i32, i32
  }
}

</mosaic_0001>

<bundles_post_ra>
// kernel: forward_pallas.1
= control target key start
LH: loop header
LB: loop body
LE: loop exit
PB: predicated region body
PF: predicated region fallthrough
CT: control target
= control target key end

     0   :  { %s1964_s21 = smov 0   ;;  %s2525_s0 = inlined_call_operand.vmem [shape: bf16[128,128], index: 0, kind: input, shape index: {}]   ;;  %s2526_s1 = inlined_call_operand.vmem [shape: bf16[128,256], index: 1, kind: input, shape index: {}]   ;;  %s2527_s2 = inlined_call_operand.vmem [shape: bf16[256,256], index: 2, kind: input, shape index: {}]   ;;  %s2528_s3 = inlined_call_operand.vmem [shape: bf16[256,256], index: 3, kind: input, shape index: {}]   ;;  %s2529_s4 = inlined_call_operand.vmem [shape: bf16[256,256], index: 4, kind: input, shape index: {}]   ;;  %s2530_s5 = inlined_call_operand.vmem [shape: f32[8,256], index: 5, kind: input, shape index: {}]   ;;  %s2531_s6 = inlined_call_operand.vmem [shape: f32[128,256], index: 6, kind: output, shape index: {}]  }
   0x1 LB: > { %s1546_s22 = sadd.s32 4294967295, %s1926_s21   ;;  %p1550_p0 = scmp.ge.s32.totalorder %s1926_s21, 1  ;;  %s1926_s21 = sphi %s1964_s21, %s16_s21  }
   0x2   : > { %p213_p1 = scmp.lt.s32.totalorder %s1926_s21, 3 }
   0x4   : > { %p214_p2 = pnand %p1550_p0, %p213_p1 }
   0x5   : > { %v1684_v0 = vld [vmem:[%s2526_s1 + $0x4] ss:$8 sps:$4 sm:$0xff] (!%p214_p2)   ;;  %s1551_s25 = sshll.u32 (!%p214_p2), %s1546_s22, 3  ;;  %v1686_v1 = vld [vmem:[%s2526_s1] ss:$8 sps:$4 sm:$0xff] (!%p214_p2)   ;;  %v1928_v2 = vmov (!%p214_p2), 0  }
   0x6   : > { %217 = sbr.rel (%p214_p2) target bundleno = 977 (0x3d1), region = 44  ;;  %428 = vmatprep.mubr.bf16.mxu0 (!%p214_p2), %v1928_v2  ;;  %p245_p3 = scmp.lt.s32.totalorder (!%p214_p2), %s1551_s25, 15  ;;  %396 = vmatprep.subr.bf16.mxu0 (!%p214_p2), %v1684_v0  ;;  %v1687_v3 = vld [vmem:[%s2526_s1 + $0x14] ss:$8 sps:$4 sm:$0xff] (!%p214_p2)   ;;  %v1689_v4 = vld [vmem:[%s2526_s1 + $0x10] ss:$8 sps:$4 sm:$0xff] (!%p214_p2)  }
   0x7   : > { %397 = vmatpush1.bf16.msra.mxu0 (!%p214_p2), %v1686_v1  ;;  %v1690_v5 = vld [vmem:[%s2526_s1 + $0x24] ss:$8 sps:$4 sm:$0xff] (!%p214_p2)   ;;  %v1692_v6 = vld [vmem:[%s2526_s1 + $0x20] ss:$8 sps:$4 sm:$0xff] (!%p214_p2)   ;;  %v1693_v7 = vld [vmem:[%s2526_s1 + $0x34] ss:$8 sps:$4 sm:$0xff] (!%p214_p2)  }
   0x8   : > { %398 = vmatprep.subr.bf16.mxu0 (!%p214_p2), %v1687_v3  ;;  %v1695_v8 = vld [vmem:[%s2526_s1 + $0x30] ss:$8 sps:$4 sm:$0xff] (!%p214_p2)   ;;  %v1696_v9 = vld [vmem:[%s2526_s1 + $0x44] ss:$8 sps:$4 sm:$0xff] (!%p214_p2)   ;;  %v1698_v10 = vld [vmem:[%s2526_s1 + $0x40] ss:$8 sps:$4 sm:$0xff] (!%p214_p2)  }
   0x9   : > { %v1699_v11 = vld [vmem:[%s2526_s1 + $0x54] ss:$8 sps:$4 sm:$0xff] (!%p214_p2)   ;;  %v1712_v12 = vld [vmem:[%s2527_s2 + $0x4] ss:$8 sps:$4 sm:$0xff] (!%p214_p2)   ;;  %v1714_v13 = vld [vmem:[%s2527_s2] ss:$8 sps:$4 sm:$0xff] (!%p214_p2)  }
   0xa   : > { %v1715_v14 = vld [vmem:[%s2527_s2 + $0x14] ss:$8 sps:$4 sm:$0xff] (!%p214_p2)   ;;  %693 = vmatprep.subr.bf16.mxu1 (!%p214_p2), %v1712_v12  ;;  %v1717_v15 = vld [vmem:[%s2527_s2 + $0x10] ss:$8 sps:$4 sm:$0xff] (!%p214_p2)   ;;  %v1718_v17 = vld [vmem:[%s2527_s2 + $0x24] ss:$8 sps:$4 sm:$0xff] (!%p214_p2)  }
   0xb   : > { %399 = vmatpush1.bf16.msra.mxu0 (!%p214_p2), %v1689_v4  ;;  %694 = vmatpush1.bf16.msra.mxu1 (!%p214_p2), %v1714_v13  ;;  %v1701_v16 = vld [vmem:[%s2526_s1 + $0x50] ss:$8 sps:$4 sm:$0xff] (!%p214_p2)   ;;  %v1702_v18 = vld [vmem:[%s2526_s1 + $0x64] ss:$8 sps:$4 sm:$0xff] (!%p214_p2)   ;;  %v1720_v19 = vld [vmem:[%s2527_s2 + $0x20] ss:$8 sps:$4 sm:$0xff] (!%p214_p2)  }
   0xc   : > { %400 = vmatprep.subr.bf16.mxu0 (!%p214_p2), %v1690_v5  ;;  %695 = vmatprep.subr.bf16.mxu1 (!%p214_p2), %v1715_v14  ;;  %v1704_v20 = vld [vmem:[%s2526_s1 + $0x60] ss:$8 sps:$4 sm:$0xff] (!%p214_p2)   ;;  %v1721_v21 = vld [vmem:[%s2527_s2 + $0x34] ss:$8 sps:$4 sm:$0xff] (!%p214_p2)   ;;  %v1723_v23 = vld [vmem:[%s2527_s2 + $0x30] ss:$8 sps:$4 sm:$0xff] (!%p214_p2)  }
   0xd   : > { %s2533_s25 = smov (!%p245_p3, %s1551_s25), 15  ;;  %v1705_v22 = vld [vmem:[%s2526_s1 + $0x74] ss:$8 sps:$4 sm:$0xff]   ;;  %v1707_v24 = vld [vmem:[%s2526_s1 + $0x70] ss:$8 sps:$4 sm:$0xff]  }
   0xe   : > { %s1552_s10 = sshll.u32 %s2533_s25, 2  ;;  %v1724_v25 = vld [vmem:[%s2527_s2 + $0x44] ss:$8 sps:$4 sm:$0xff]   ;;  %v1726_v27 = vld [vmem:[%s2527_s2 + $0x40] ss:$8 sps:$4 sm:$0xff]   ;;  %s1674_s14 = sshll.u32 %s2533_s25, 4 }
   0xf   : > { %s2000_s17 = scalar_lea.vmem %s2525_s0, %s1552_s10  ;;  %401 = vmatpush1.bf16.msra.mxu0 %v1692_v6  ;;  %696 = vmatpush1.bf16.msra.mxu1 %v1717_v15  ;;  %v1727_v28 = vld [vmem:[%s2527_s2 + $0x54] ss:$8 sps:$4 sm:$0xff]   ;;  %v1729_v29 = vld [vmem:[%s2527_s2 + $0x50] ss:$8 sps:$4 sm:$0xff]   ;;  %v1730_v30 = vld [vmem:[%s2527_s2 + $0x64] ss:$8 sps:$4 sm:$0xff]   ;;  %s2503_s16 = scalar_lea.vmem %s2531_s6, %s1674_s14 }
  0x10   : > { %402 = vmatprep.subr.bf16.mxu0 %v1693_v7  ;;  %697 = vmatprep.subr.bf16.mxu1 %v1718_v17  ;;  %v1708_v26 = vld [vmem:[%s2000_s17] sm:$0xff]   ;;  %v1709_v31 = vld [vmem:[%s2000_s17 + $0x8] sm:$0xff]   ;;  %v1733_v33 = vld [vmem:[%s2527_s2 + $0x74] ss:$8 sps:$4 sm:$0xff]   ;;  %v284_v17 = vlaneseq }
  0x11   : > { %v1732_v32 = vld [vmem:[%s2527_s2 + $0x60] ss:$8 sps:$4 sm:$0xff]   ;;  %v1735_v34 = vld [vmem:[%s2527_s2 + $0x70] ss:$8 sps:$4 sm:$0xff]   ;;  %v1736_v35 = vld [vmem:[%s2527_s2 + $0x84] ss:$8 sps:$4 sm:$0xff]  }
  0x12   : > { %v1710_v36 = vld [vmem:[%s2000_s17 + $0x10] sm:$0xff]   ;;  %v1738_v37 = vld [vmem:[%s2527_s2 + $0x80] ss:$8 sps:$4 sm:$0xff]   ;;  %v1742_v40 = vld [vmem:[%s2527_s2 + $0xa4] ss:$8 sps:$4 sm:$0xff]  }
  0x13   : > { %403 = vmatpush1.bf16.msra.mxu0 %v1695_v8  ;;  %698 = vmatpush1.bf16.msra.mxu1 %v1720_v19  ;;  %v1739_v38 = vld [vmem:[%s2527_s2 + $0x94] ss:$8 sps:$4 sm:$0xff]   ;;  %v1741_v39 = vld [vmem:[%s2527_s2 + $0x90] ss:$8 sps:$4 sm:$0xff]   ;;  %v1744_v42 = vld [vmem:[%s2527_s2 + $0xa0] ss:$8 sps:$4 sm:$0xff]  }
  0x14   : > { %404 = vmatprep.subr.bf16.mxu0 %v1696_v9  ;;  %699 = vmatprep.subr.bf16.mxu1 %v1721_v21  ;;  %v1711_v41 = vld [vmem:[%s2000_s17 + $0x18] sm:$0xff]   ;;  %v1748_v45 = vld [vmem:[%s2527_s2 + $0xc4] ss:$8 sps:$4 sm:$0xff]   ;;  %v1750_v46 = vld [vmem:[%s2527_s2 + $0xc0] ss:$8 sps:$4 sm:$0xff]  }
  0x15   : > { %v1745_v43 = vld [vmem:[%s2527_s2 + $0xb4] ss:$8 sps:$4 sm:$0xff]   ;;  %v1747_v44 = vld [vmem:[%s2527_s2 + $0xb0] ss:$8 sps:$4 sm:$0xff]   ;;  %v1754_v49 = vld [vmem:[%s2527_s2 + $0xe4] ss:$8 sps:$4 sm:$0xff]  }
  0x16   : > { %v1751_v47 = vld [vmem:[%s2527_s2 + $0xd4] ss:$8 sps:$4 sm:$0xff]   ;;  %v1753_v48 = vld [vmem:[%s2527_s2 + $0xd0] ss:$8 sps:$4 sm:$0xff]   ;;  %v1756_v50 = vld [vmem:[%s2527_s2 + $0xe0] ss:$8 sps:$4 sm:$0xff]  }
  0x17   : > { %405 = vmatpush1.bf16.msra.mxu0 %v1698_v10  ;;  %700 = vmatpush1.bf16.msra.mxu1 %v1723_v23  ;;  %v1757_v51 = vld [vmem:[%s2527_s2 + $0xf4] ss:$8 sps:$4 sm:$0xff]   ;;  %v1759_v52 = vld [vmem:[%s2527_s2 + $0xf0] ss:$8 sps:$4 sm:$0xff]   ;;  %v1760_v53 = vld [vmem:[%s2528_s3] ss:$8 sps:$4 sm:$0xff]  }
  0x18   : > { %406 = vmatprep.subr.bf16.mxu0 %v1699_v11  ;;  %701 = vmatprep.subr.bf16.mxu1 %v1724_v25  ;;  %v1762_v54 = vld [vmem:[%s2528_s3 + $0x4] ss:$8 sps:$4 sm:$0xff]   ;;  %v1765_v55 = vld [vmem:[%s2528_s3 + $0x14] ss:$8 sps:$4 sm:$0xff]   ;;  %v1763_v56 = vld [vmem:[%s2528_s3 + $0x10] ss:$8 sps:$4 sm:$0xff]  }
  0x19   : > { %v1768_v57 = vld [vmem:[%s2528_s3 + $0x24] ss:$8 sps:$4 sm:$0xff]   ;;  %v1766_v58 = vld [vmem:[%s2528_s3 + $0x20] ss:$8 sps:$4 sm:$0xff]   ;;  %v1771_v59 = vld [vmem:[%s2528_s3 + $0x34] ss:$8 sps:$4 sm:$0xff]  }
  0x1a   : > { %v1769_v60 = vld [vmem:[%s2528_s3 + $0x30] ss:$8 sps:$4 sm:$0xff]   ;;  %v1774_v61 = vld [vmem:[%s2528_s3 + $0x44] ss:$8 sps:$4 sm:$0xff]   ;;  %v1772_v62 = vld [vmem:[%s2528_s3 + $0x40] ss:$8 sps:$4 sm:$0xff]  }
  0x1b   : > { %407 = vmatpush1.bf16.msra.mxu0 %v1701_v16  ;;  %702 = vmatpush1.bf16.msra.mxu1 %v1726_v27  ;;  %v1777_v63 = vld [vmem:[%s2528_s3 + $0x54] ss:$8 sps:$4 sm:$0xff]   ;;  %v1775_v0 = vld [vmem:[%s2528_s3 + $0x50] ss:$8 sps:$4 sm:$0xff]   ;;  %v1780_v1 = vld [vmem:[%s2528_s3 + $0x64] ss:$8 sps:$4 sm:$0xff]  }
  0x1c   : > { %408 = vmatprep.subr.bf16.mxu0 %v1702_v18  ;;  %703 = vmatprep.subr.bf16.mxu1 %v1727_v28  ;;  %v1783_v3 = vld [vmem:[%s2528_s3 + $0x74] ss:$8 sps:$4 sm:$0xff]   ;;  %v1781_v4 = vld [vmem:[%s2528_s3 + $0x70] ss:$8 sps:$4 sm:$0xff]   ;;  %v1786_v5 = vld [vmem:[%s2528_s3 + $0x84] ss:$8 sps:$4 sm:$0xff]  }
  0x1d   : > { %v1784_v6 = vld [vmem:[%s2528_s3 + $0x80] ss:$8 sps:$4 sm:$0xff]   ;;  %v1789_v7 = vld [vmem:[%s2528_s3 + $0x94] ss:$8 sps:$4 sm:$0xff]   ;;  %v1787_v8 = vld [vmem:[%s2528_s3 + $0x90] ss:$8 sps:$4 sm:$0xff]  }
  0x1e   : > { %v1792_v9 = vld [vmem:[%s2528_s3 + $0xa4] ss:$8 sps:$4 sm:$0xff]   ;;  %v1790_v10 = vld [vmem:[%s2528_s3 + $0xa0] ss:$8 sps:$4 sm:$0xff]   ;;  %v1795_v11 = vld [vmem:[%s2528_s3 + $0xb4] ss:$8 sps:$4 sm:$0xff]  }
  0x1f   : > { %409 = vmatpush1.bf16.msra.mxu0 %v1704_v20  ;;  %704 = vmatpush1.bf16.msra.mxu1 %v1729_v29  ;;  %v1793_v12 = vld [vmem:[%s2528_s3 + $0xb0] ss:$8 sps:$4 sm:$0xff]   ;;  %v1798_v13 = vld [vmem:[%s2528_s3 + $0xc4] ss:$8 sps:$4 sm:$0xff]   ;;  %v1796_v14 = vld [vmem:[%s2528_s3 + $0xc0] ss:$8 sps:$4 sm:$0xff]  }
  0x20   : > { %410 = vmatprep.subr.bf16.mxu0 %v1705_v22  ;;  %705 = vmatprep.subr.bf16.mxu1 %v1730_v30  ;;  %v1801_v15 = vld [vmem:[%s2528_s3 + $0xd4] ss:$8 sps:$4 sm:$0xff]   ;;  %v1799_v16 = vld [vmem:[%s2528_s3 + $0xd0] ss:$8 sps:$4 sm:$0xff]   ;;  %v2216_v18 = vshrl.u32 %v284_v17, 7  ;;  %v2222_v20 = vld [vmem:[%s2530_s5 + $0x8] sm:$0xff] }
  0x21   : > { %v2227_v21 = vld [vmem:[%s2530_s5] sm:$0xff] }
  0x22   : > { %v286_v19 = vsub.s32 0, %v2216_v18  ;;  %v1802_v17 = vld [vmem:[%s2528_s3 + $0xe0] ss:$8 sps:$4 sm:$0xff]  }
  0x23   : > { %411 = vmatpush1.bf16.msra.mxu0 %v1707_v24  ;;  %706 = vmatpush1.bf16.msra.mxu1 %v1732_v32 }
  0x24   : > { %707 = vmatprep.subr.bf16.mxu1 %v1733_v33  ;;  %990 = vmatprep.subr.bf16.mxu0 %v1762_v54  ;;  %v291_v22 = vrot.slane %v2222_v20, %v286_v19  ;;  %v287_v23 = vrot.slane %v2227_v21, %v286_v19  ;;  %v1807_v19 = vld [vmem:[%s2528_s3 + $0xf4] ss:$8 sps:$4 sm:$0xff]  }
  0x26   : > { %429 = vmatmul.mubr.bf16.vlgmr.msra.gmra.mrb[0].mxu0 %v1708_v26 }
  0x27   : > { %438 = vmatprep.mubr.bf16.mxu0 %v1928_v2  ;;  %708 = vmatpush1.bf16.msra.mxu1 %v1735_v34 }
  0x28   : > { %709 = vmatprep.subr.bf16.mxu1 %v1736_v35  ;;  %991 = vmatpush1.bf16.msra.mxu0 %v1760_v53 }
  0x29   : > { %992 = vmatprep.subr.bf16.mxu0 %v1765_v55 }
  0x2b   : > { %710 = vmatpush1.bf16.msra.mxu1 %v1738_v37 }
  0x2c   : > { %711 = vmatprep.subr.bf16.mxu1 %v1739_v38  ;;  %993 = vmatpush1.bf16.msra.mxu0 %v1763_v56 }
  0x2d   : > { %994 = vmatprep.subr.bf16.mxu0 %v1768_v57 }
  0x2e   : > { %439 = vmatmul.mubr.bf16.gmra.mrb[4].mxu0 %v1709_v31 }
  0x2f   : > { %448 = vmatprep.mubr.bf16.mxu0 %v1928_v2  ;;  %712 = vmatpush1.bf16.msra.mxu1 %v1741_v39 }
  0x30   : > { %713 = vmatprep.subr.bf16.mxu1 %v1742_v40  ;;  %995 = vmatpush1.bf16.msra.mxu0 %v1766_v58 }
  0x31   : > { %996 = vmatprep.subr.bf16.mxu0 %v1771_v59 }
  0x33   : > { %714 = vmatpush1.bf16.msra.mxu1 %v1744_v42 }
  0x34   : > { %715 = vmatprep.subr.bf16.mxu1 %v1745_v43  ;;  %997 = vmatpush1.bf16.msra.mxu0 %v1769_v60 }
  0x35   : > { %998 = vmatprep.subr.bf16.mxu0 %v1774_v61 }
  0x36   : > { %449 = vmatmul.mubr.bf16.gmra.mrb[8].mxu0 %v1710_v36 }
  0x37   : > { %458 = vmatprep.mubr.bf16.mxu0 %v1928_v2  ;;  %716 = vmatpush1.bf16.msra.mxu1 %v1747_v44  ;;  %v1778_v2 = vld [vmem:[%s2528_s3 + $0x60] ss:$8 sps:$4 sm:$0xff]  }
  0x38   : > { %717 = vmatprep.subr.bf16.mxu1 %v1748_v45  ;;  %999 = vmatpush1.bf16.msra.mxu0 %v1772_v62 }
  0x39   : > { %1000 = vmatprep.subr.bf16.mxu0 %v1777_v63 }
  0x3b   : > { %718 = vmatpush1.bf16.msra.mxu1 %v1750_v46 }
  0x3c   : > { %719 = vmatprep.subr.bf16.mxu1 %v1751_v47  ;;  %1001 = vmatpush1.bf16.msra.mxu0 %v1775_v0 }
  0x3d   : > { %1002 = vmatprep.subr.bf16.mxu0 %v1780_v1 }
  0x3e   : > { %459 = vmatmul.mubr.bf16.gmra.mrb[12].mxu0 %v1711_v41 }
  0x3f   : > { %720 = vmatpush1.bf16.msra.mxu1 %v1753_v48 }
  0x40   : > { %721 = vmatprep.subr.bf16.mxu1 %v1754_v49  ;;  %1003 = vmatpush1.bf16.msra.mxu0 %v1778_v2 }
  0x41   : > { %1004 = vmatprep.subr.bf16.mxu0 %v1783_v3 }
  0x43   : > { %722 = vmatpush1.bf16.msra.mxu1 %v1756_v50 }
  0x44   : > { %723 = vmatprep.subr.bf16.mxu1 %v1757_v51  ;;  %1005 = vmatpush1.bf16.msra.mxu0 %v1781_v4 }
  0x45   : > { %1006 = vmatprep.subr.bf16.mxu0 %v1786_v5 }
  0x47   : > { %724 = vmatpush1.bf16.msra.mxu1 %v1759_v52 }
  0x48   : > { %1007 = vmatpush1.bf16.msra.mxu0 %v1784_v6 }
  0x49   : > { %1008 = vmatprep.subr.bf16.mxu0 %v1789_v7 }
  0x4c   : > { %1009 = vmatpush1.bf16.msra.mxu0 %v1787_v8 }
  0x4d   : > { %1010 = vmatprep.subr.bf16.mxu0 %v1792_v9 }
  0x50   : > { %1011 = vmatpush1.bf16.msra.mxu0 %v1790_v10 }
  0x51   : > { %1012 = vmatprep.subr.bf16.mxu0 %v1795_v11 }
  0x54   : > { %1013 = vmatpush1.bf16.msra.mxu0 %v1793_v12 }
  0x55   : > { %1014 = vmatprep.subr.bf16.mxu0 %v1798_v13 }
  0x58   : > { %1015 = vmatpush1.bf16.msra.mxu0 %v1796_v14 }
  0x59   : > { %1016 = vmatprep.subr.bf16.mxu0 %v1801_v15 }
  0x5c   : > { %1017 = vmatpush1.bf16.msra.mxu0 %v1799_v16  ;;  %v1804_v16 = vld [vmem:[%s2528_s3 + $0xe4] ss:$8 sps:$4 sm:$0xff]  }
  0x5d   : > { %1018 = vmatprep.subr.bf16.mxu0 %v1804_v16  ;;  %v1844_v16 = vld [vmem:[%s2529_s4 + $0xc0] ss:$8 sps:$4 sm:$0xff]  }
  0x60   : > { %1019 = vmatpush1.bf16.msra.mxu0 %v1802_v17  ;;  %v527_v17 = vsub.s32 1, %v2216_v18 }
  0x61   : > { %1020 = vmatprep.subr.bf16.mxu0 %v1807_v19 }
  0x62   : > { %v528_v19 = vrot.slane %v2227_v21, %v527_v17 }
  0xf9   : > { %v430_v24 = vpop.f32.mrb[0].mxu0 }
  0xfa   : > { %v432_v25 = vpop.f32.mrb[1].mxu0  ;;  %v2233_v28 = vadd.f32 %v430_v24, %v287_v23  ;;  %v1810_v24 = vld [vmem:[%s2529_s4 + $0x4] ss:$8 sps:$4 sm:$0xff]  }
  0xfb   : > { %v2231_v26 = vadd.f32 %v432_v25, %v291_v22  ;;  %v434_v27 = vpop.f32.mrb[2].mxu0  ;;  %v1813_v25 = vld [vmem:[%s2529_s4 + $0x14] ss:$8 sps:$4 sm:$0xff]   ;;  %1303 = vmatprep.subr.bf16.mxu1 %v1810_v24 }
  0xfc   : > { %v2235_v29 = vadd.f32 %v434_v27, %v287_v23  ;;  %v436_v30 = vpop.f32.mrb[3].mxu0  ;;  %v469_v35 = vmax.f32 %v2233_v28, 0.0  ;;  %v1811_v27 = vld [vmem:[%s2529_s4 + $0x10] ss:$8 sps:$4 sm:$0xff]  }
  0xfd   : > { %v2237_v31 = vadd.f32 %v436_v30, %v291_v22  ;;  %v470_v33 = vmax.f32 %v2231_v26, 0.0  ;;  %v1816_v30 = vld [vmem:[%s2529_s4 + $0x24] ss:$8 sps:$4 sm:$0xff]  }
  0xfe   : > { %v471_v32 = vmax.f32 %v2235_v29, 0.0 }
  0xff   : > { %v472_v34 = vmax.f32 %v2237_v31, 0.0 }
 0x100   : > { %v517_v38 = vpack.c.bf16 %v471_v32, %v469_v35 }
 0x101   : > { %v440_v36 = vpop.f32.mrb[4].mxu0  ;;  %v518_v37 = vpack.c.bf16 %v472_v34, %v470_v33 }
 0x102   : > { %v442_v39 = vpop.f32.mrb[5].mxu0  ;;  %v2253_v42 = vadd.f32 %v440_v36, %v287_v23  ;;  %v1814_v36 = vld [vmem:[%s2529_s4 + $0x20] ss:$8 sps:$4 sm:$0xff]  }
 0x103   : > { %v2251_v40 = vadd.f32 %v442_v39, %v291_v22  ;;  %v444_v41 = vpop.f32.mrb[6].mxu0  ;;  %725 = vmatprep.mubr.bf16.mxu1 %v518_v37  ;;  %v1819_v37 = vld [vmem:[%s2529_s4 + $0x34] ss:$8 sps:$4 sm:$0xff]   ;;  %v1822_v39 = vld [vmem:[%s2529_s4 + $0x44] ss:$8 sps:$4 sm:$0xff]  }
 0x104   : > { %v2255_v43 = vadd.f32 %v444_v41, %v287_v23  ;;  %v446_v44 = vpop.f32.mrb[7].mxu0  ;;  %726 = vmatmul.mubr.bf16.vlgmr.msra.gmra.mrb[0].mxu1 %v517_v38  ;;  %v473_v49 = vmax.f32 %v2253_v42, 0.0  ;;  %v1817_v38 = vld [vmem:[%s2529_s4 + $0x30] ss:$8 sps:$4 sm:$0xff]   ;;  %v1820_v41 = vld [vmem:[%s2529_s4 + $0x40] ss:$8 sps:$4 sm:$0xff]  }
 0x105   : > { %v2257_v45 = vadd.f32 %v446_v44, %v291_v22  ;;  %v474_v47 = vmax.f32 %v2251_v40, 0.0  ;;  %v1825_v44 = vld [vmem:[%s2529_s4 + $0x54] ss:$8 sps:$4 sm:$0xff]  }
 0x106   : > { %v475_v46 = vmax.f32 %v2255_v43, 0.0 }
 0x107   : > { %v476_v48 = vmax.f32 %v2257_v45, 0.0 }
 0x108   : > { %v519_v52 = vpack.c.bf16 %v475_v46, %v473_v49 }
 0x109   : > { %v520_v50 = vpack.c.bf16 %v476_v48, %v474_v47  ;;  %v450_v51 = vpop.f32.mrb[8].mxu0 }
 0x10a   : > { %v452_v53 = vpop.f32.mrb[9].mxu0  ;;  %v2273_v56 = vadd.f32 %v450_v51, %v287_v23  ;;  %v1828_v51 = vld [vmem:[%s2529_s4 + $0x64] ss:$8 sps:$4 sm:$0xff]  }
 0x10b   : > { %v2271_v54 = vadd.f32 %v452_v53, %v291_v22  ;;  %v454_v55 = vpop.f32.mrb[10].mxu0  ;;  %735 = vmatprep.mubr.bf16.mxu1 %v520_v50  ;;  %v1823_v50 = vld [vmem:[%s2529_s4 + $0x50] ss:$8 sps:$4 sm:$0xff]   ;;  %v1831_v53 = vld [vmem:[%s2529_s4 + $0x74] ss:$8 sps:$4 sm:$0xff]  }
 0x10c   : > { %v2275_v57 = vadd.f32 %v454_v55, %v287_v23  ;;  %v456_v58 = vpop.f32.mrb[11].mxu0  ;;  %736 = vmatmul.mubr.bf16.gmra.mrb[4].mxu1 %v519_v52  ;;  %v477_v63 = vmax.f32 %v2273_v56, 0.0  ;;  %v1826_v52 = vld [vmem:[%s2529_s4 + $0x60] ss:$8 sps:$4 sm:$0xff]   ;;  %v1829_v55 = vld [vmem:[%s2529_s4 + $0x70] ss:$8 sps:$4 sm:$0xff]  }
 0x10d   : > { %v2277_v59 = vadd.f32 %v456_v58, %v291_v22  ;;  %v478_v61 = vmax.f32 %v2271_v54, 0.0  ;;  %v1834_v58 = vld [vmem:[%s2529_s4 + $0x84] ss:$8 sps:$4 sm:$0xff]  }
 0x10e   : > { %v479_v60 = vmax.f32 %v2275_v57, 0.0 }
 0x10f   : > { %v480_v62 = vmax.f32 %v2277_v59, 0.0 }
 0x110   : > { %v521_v2 = vpack.c.bf16 %v479_v60, %v477_v63 }
 0x111   : > { %v522_v0 = vpack.c.bf16 %v480_v62, %v478_v61  ;;  %v460_v1 = vpop.f32.mrb[12].mxu0 }
 0x112   : > { %v462_v3 = vpop.f32.mrb[13].mxu0  ;;  %v2293_v6 = vadd.f32 %v460_v1, %v287_v23  ;;  %v1837_v1 = vld [vmem:[%s2529_s4 + $0x94] ss:$8 sps:$4 sm:$0xff]  }
 0x113   : > { %v2291_v4 = vadd.f32 %v462_v3, %v291_v22  ;;  %v464_v5 = vpop.f32.mrb[14].mxu0  ;;  %745 = vmatprep.mubr.bf16.mxu1 %v522_v0  ;;  %v1832_v0 = vld [vmem:[%s2529_s4 + $0x80] ss:$8 sps:$4 sm:$0xff]   ;;  %v1840_v3 = vld [vmem:[%s2529_s4 + $0xa4] ss:$8 sps:$4 sm:$0xff]  }
 0x114   : > { %v2295_v7 = vadd.f32 %v464_v5, %v287_v23  ;;  %v466_v8 = vpop.f32.mrb[15].mxu0  ;;  %746 = vmatmul.mubr.bf16.gmra.mrb[8].mxu1 %v521_v2  ;;  %v481_v13 = vmax.f32 %v2293_v6, 0.0  ;;  %v1808_v23 = vld [vmem:[%s2529_s4] ss:$8 sps:$4 sm:$0xff]   ;;  %v1835_v2 = vld [vmem:[%s2529_s4 + $0x90] ss:$8 sps:$4 sm:$0xff]  }
 0x115   : > { %v2297_v9 = vadd.f32 %v466_v8, %v291_v22  ;;  %v482_v11 = vmax.f32 %v2291_v4, 0.0  ;;  %v1805_v22 = vld [vmem:[%s2528_s3 + $0xf0] ss:$8 sps:$4 sm:$0xff]   ;;  %1304 = vmatpush1.bf16.msra.mxu1 %v1808_v23  ;;  %v1838_v5 = vld [vmem:[%s2529_s4 + $0xa0] ss:$8 sps:$4 sm:$0xff]   ;;  %v1137_v4 = vsub.s32 3, %v2216_v18 }
 0x116   : > { %v483_v10 = vmax.f32 %v2295_v7, 0.0  ;;  %1021 = vmatpush1.bf16.msra.mxu0 %v1805_v22  ;;  %1305 = vmatprep.subr.bf16.mxu1 %v1813_v25  ;;  %v1843_v8 = vld [vmem:[%s2529_s4 + $0xb4] ss:$8 sps:$4 sm:$0xff]   ;;  %v532_v22 = vrot.slane %v2222_v20, %v527_v17 }
 0x117   : > { %v484_v12 = vmax.f32 %v2297_v9, 0.0  ;;  %v2482_v7 = vrot.slane %v2222_v20, %v1137_v4 }
 0x118   : > { %v523_v15 = vpack.c.bf16 %v483_v10, %v481_v13 }
 0x119   : > { %v524_v14 = vpack.c.bf16 %v484_v12, %v482_v11  ;;  %1306 = vmatpush1.bf16.msra.mxu1 %v1811_v27 }
 0x11a   : > { %1307 = vmatprep.subr.bf16.mxu1 %v1816_v30 }
 0x11b   : > { %755 = vmatprep.mubr.bf16.mxu1 %v524_v14  ;;  %v1841_v14 = vld [vmem:[%s2529_s4 + $0xb0] ss:$8 sps:$4 sm:$0xff]  }
 0x11c   : > { %756 = vmatmul.mubr.bf16.gmra.mrb[12].mxu1 %v523_v15  ;;  %v1846_v15 = vld [vmem:[%s2529_s4 + $0xc4] ss:$8 sps:$4 sm:$0xff]  }
 0x11d   : > { %1308 = vmatpush1.bf16.msra.mxu1 %v1814_v36 }
 0x11e   : > { %1309 = vmatprep.subr.bf16.mxu1 %v1819_v37 }
 0x121   : > { %1310 = vmatpush1.bf16.msra.mxu1 %v1817_v38 }
 0x122   : > { %1311 = vmatprep.subr.bf16.mxu1 %v1822_v39 }
 0x125   : > { %1312 = vmatpush1.bf16.msra.mxu1 %v1820_v41 }
 0x126   : > { %1313 = vmatprep.subr.bf16.mxu1 %v1825_v44 }
 0x129   : > { %1314 = vmatpush1.bf16.msra.mxu1 %v1823_v50 }
 0x12a   : > { %1315 = vmatprep.subr.bf16.mxu1 %v1828_v51 }
 0x12d   : > { %1316 = vmatpush1.bf16.msra.mxu1 %v1826_v52 }
 0x12e   : > { %1317 = vmatprep.subr.bf16.mxu1 %v1831_v53 }
 0x131   : > { %1318 = vmatpush1.bf16.msra.mxu1 %v1829_v55 }
 0x132   : > { %1319 = vmatprep.subr.bf16.mxu1 %v1834_v58 }
 0x135   : > { %1320 = vmatpush1.bf16.msra.mxu1 %v1832_v0 }
 0x136   : > { %1321 = vmatprep.subr.bf16.mxu1 %v1837_v1 }
 0x139   : > { %1322 = vmatpush1.bf16.msra.mxu1 %v1835_v2 }
 0x13a   : > { %1323 = vmatprep.subr.bf16.mxu1 %v1840_v3 }
 0x13d   : > { %1324 = vmatpush1.bf16.msra.mxu1 %v1838_v5 }
 0x13e   : > { %1325 = vmatprep.subr.bf16.mxu1 %v1843_v8 }
 0x141   : > { %1326 = vmatpush1.bf16.msra.mxu1 %v1841_v14 }
 0x142   : > { %1327 = vmatprep.subr.bf16.mxu1 %v1846_v15 }
 0x145   : > { %1328 = vmatpush1.bf16.msra.mxu1 %v1844_v16 }
 0x1d7   : > { %v727_v23 = vpop.f32.mrb[0].mxu1 }
 0x1d8   : > { %v728_v24 = vadd.f32 %v727_v23, %v528_v19  ;;  %v729_v25 = vpop.f32.mrb[1].mxu1 }
 0x1d9   : > { %v730_v27 = vadd.f32 %v729_v25, %v532_v22  ;;  %v731_v30 = vpop.f32.mrb[2].mxu1 }
 0x1da   : > { %v732_v36 = vadd.f32 %v731_v30, %v528_v19  ;;  %v733_v37 = vpop.f32.mrb[3].mxu1  ;;  %v766_v39 = vmax.f32 %v728_v24, 0.0 }
 0x1db   : > { %v734_v38 = vadd.f32 %v733_v37, %v532_v22  ;;  %v767_v44 = vmax.f32 %v730_v27, 0.0 }
 0x1dc   : > { %v768_v41 = vmax.f32 %v732_v36, 0.0 }
 0x1dd   : > { %v769_v50 = vmax.f32 %v734_v38, 0.0 }
 0x1de   : > { %v814_v51 = vpack.c.bf16 %v768_v41, %v766_v39 }
 0x1df   : > { %v815_v52 = vpack.c.bf16 %v769_v50, %v767_v44  ;;  %v737_v53 = vpop.f32.mrb[4].mxu1 }
 0x1e0   : > { %v738_v55 = vadd.f32 %v737_v53, %v528_v19  ;;  %v739_v58 = vpop.f32.mrb[5].mxu1 }
 0x1e1   : > { %v740_v0 = vadd.f32 %v739_v58, %v532_v22  ;;  %v741_v1 = vpop.f32.mrb[6].mxu1  ;;  %1022 = vmatprep.mubr.bf16.mxu0 %v815_v52 }
 0x1e2   : > { %v742_v2 = vadd.f32 %v741_v1, %v528_v19  ;;  %v743_v3 = vpop.f32.mrb[7].mxu1  ;;  %1023 = vmatmul.mubr.bf16.vlgmr.msra.gmra.mrb[16].mxu0 %v814_v51  ;;  %v770_v8 = vmax.f32 %v738_v55, 0.0 }
 0x1e3   : > { %v744_v5 = vadd.f32 %v743_v3, %v532_v22  ;;  %v771_v15 = vmax.f32 %v740_v0, 0.0 }
 0x1e4   : > { %v772_v14 = vmax.f32 %v742_v2, 0.0 }
 0x1e5   : > { %v773_v16 = vmax.f32 %v744_v5, 0.0 }
 0x1e6   : > { %v816_v17 = vpack.c.bf16 %v772_v14, %v770_v8 }
 0x1e7   : > { %v817_v23 = vpack.c.bf16 %v773_v16, %v771_v15  ;;  %v747_v24 = vpop.f32.mrb[8].mxu1 }
 0x1e8   : > { %v748_v25 = vadd.f32 %v747_v24, %v528_v19  ;;  %v749_v27 = vpop.f32.mrb[9].mxu1 }
 0x1e9   : > { %v750_v30 = vadd.f32 %v749_v27, %v532_v22  ;;  %v751_v36 = vpop.f32.mrb[10].mxu1  ;;  %1032 = vmatprep.mubr.bf16.mxu0 %v817_v23  ;;  %v1847_v27 = vld [vmem:[%s2529_s4 + $0xd0] ss:$8 sps:$4 sm:$0xff]  }
 0x1ea   : > { %v752_v37 = vadd.f32 %v751_v36, %v528_v19  ;;  %v753_v38 = vpop.f32.mrb[11].mxu1  ;;  %1033 = vmatmul.mubr.bf16.gmra.mrb[20].mxu0 %v816_v17  ;;  %v774_v41 = vmax.f32 %v748_v25, 0.0  ;;  %v1849_v25 = vld [vmem:[%s2529_s4 + $0xd4] ss:$8 sps:$4 sm:$0xff]   ;;  %v1853_v36 = vld [vmem:[%s2529_s4 + $0xf0] ss:$8 sps:$4 sm:$0xff]  }
 0x1eb   : > { %v754_v39 = vadd.f32 %v753_v38, %v532_v22  ;;  %v775_v50 = vmax.f32 %v750_v30, 0.0  ;;  %1329 = vmatprep.subr.bf16.mxu1 %v1849_v25  ;;  %v1855_v30 = vld [vmem:[%s2529_s4 + $0xf4] ss:$8 sps:$4 sm:$0xff]  }
 0x1ec   : > { %v776_v44 = vmax.f32 %v752_v37, 0.0  ;;  %1330 = vmatpush1.bf16.msra.mxu1 %v1847_v27  ;;  %v824_v37 = vsub.s32 2, %v2216_v18 }
 0x1ed   : > { %v777_v51 = vmax.f32 %v754_v39, 0.0 }
 0x1ee   : > { %v818_v52 = vpack.c.bf16 %v776_v44, %v774_v41  ;;  %v2424_v38 = vrot.slane %v2227_v21, %v824_v37  ;;  %v2427_v39 = vrot.slane %v2222_v20, %v824_v37 }
 0x1ef   : > { %v819_v53 = vpack.c.bf16 %v777_v51, %v775_v50  ;;  %v757_v55 = vpop.f32.mrb[12].mxu1 }
 0x1f0   : > { %v758_v58 = vadd.f32 %v757_v55, %v528_v19  ;;  %v759_v0 = vpop.f32.mrb[13].mxu1 }
 0x1f1   : > { %v760_v1 = vadd.f32 %v759_v0, %v532_v22  ;;  %v761_v2 = vpop.f32.mrb[14].mxu1  ;;  %1042 = vmatprep.mubr.bf16.mxu0 %v819_v53 }
 0x1f2   : > { %v762_v3 = vadd.f32 %v761_v2, %v528_v19  ;;  %v763_v5 = vpop.f32.mrb[15].mxu1  ;;  %1043 = vmatmul.mubr.bf16.gmra.mrb[24].mxu0 %v818_v52  ;;  %v778_v14 = vmax.f32 %v758_v58, 0.0  ;;  %v1852_v19 = vld [vmem:[%s2529_s4 + $0xe4] ss:$8 sps:$4 sm:$0xff]  }
 0x1f3   : > { %v764_v8 = vadd.f32 %v763_v5, %v532_v22  ;;  %v779_v16 = vmax.f32 %v760_v1, 0.0  ;;  %v1850_v22 = vld [vmem:[%s2529_s4 + $0xe0] ss:$8 sps:$4 sm:$0xff]   ;;  %1331 = vmatprep.subr.bf16.mxu1 %v1852_v19 }
 0x1f4   : > { %v780_v15 = vmax.f32 %v762_v3, 0.0  ;;  %1332 = vmatpush1.bf16.msra.mxu1 %v1850_v22 }
 0x1f5   : > { %v781_v17 = vmax.f32 %v764_v8, 0.0  ;;  %1333 = vmatprep.subr.bf16.mxu1 %v1855_v30 }
 0x1f6   : > { %v820_v23 = vpack.c.bf16 %v780_v15, %v778_v14 }
 0x1f7   : > { %v821_v24 = vpack.c.bf16 %v781_v17, %v779_v16 }
 0x1f8   : > { %1334 = vmatpush1.bf16.msra.mxu1 %v1853_v36 }
 0x1f9   : > { %1052 = vmatprep.mubr.bf16.mxu0 %v821_v24 }
 0x1fa   : > { %1053 = vmatmul.mubr.bf16.gmra.mrb[28].mxu0 %v820_v23 }
 0x2b5   : > { %v1024_v41 = vpop.f32.mrb[16].mxu0 }
 0x2b6   : > { %v1025_v44 = vadd.f32 %v1024_v41, %v2424_v38  ;;  %v1026_v50 = vpop.f32.mrb[17].mxu0 }
 0x2b7   : > { %v1027_v51 = vadd.f32 %v1026_v50, %v2427_v39  ;;  %v1028_v52 = vpop.f32.mrb[18].mxu0 }
 0x2b8   : > { %v1063_v53 = vadd.f32 %v1025_v44, %v469_v35  ;;  %v1029_v55 = vadd.f32 %v1028_v52, %v2424_v38  ;;  %v1030_v58 = vpop.f32.mrb[19].mxu0 }
 0x2b9   : > { %v1064_v0 = vadd.f32 %v1027_v51, %v470_v33  ;;  %v1031_v1 = vadd.f32 %v1030_v58, %v2427_v39 }
 0x2ba   : > { %v1065_v2 = vadd.f32 %v1029_v55, %v471_v32  ;;  %v1079_v5 = vmax.f32 %v1063_v53, 0.0 }
 0x2bb   : > { %v1066_v3 = vadd.f32 %v1031_v1, %v472_v34  ;;  %v1080_v14 = vmax.f32 %v1064_v0, 0.0 }
 0x2bc   : > { %v1081_v8 = vmax.f32 %v1065_v2, 0.0 }
 0x2bd   : > { %v1082_v15 = vmax.f32 %v1066_v3, 0.0  ;;  %v1034_v28 = vpop.f32.mrb[20].mxu0 }
 0x2be   : > { %v1127_v35 = vpack.c.bf16 %v1081_v8, %v1079_v5  ;;  %v1035_v16 = vadd.f32 %v1034_v28, %v2424_v38  ;;  %v1036_v17 = vpop.f32.mrb[21].mxu0 }
 0x2bf   : > { %v1037_v26 = vadd.f32 %v1036_v17, %v2427_v39  ;;  %v1038_v33 = vpop.f32.mrb[22].mxu0  ;;  %v1128_v23 = vpack.c.bf16 %v1082_v15, %v1080_v14 }
 0x2c0   : > { %v1067_v29 = vadd.f32 %v1035_v16, %v473_v49  ;;  %v1039_v32 = vadd.f32 %v1038_v33, %v2424_v38  ;;  %v1040_v31 = vpop.f32.mrb[23].mxu0 }
 0x2c1   : > { %v1068_v34 = vadd.f32 %v1037_v26, %v474_v47  ;;  %v1041_v24 = vadd.f32 %v1040_v31, %v2427_v39  ;;  %1335 = vmatprep.mubr.bf16.mxu1 %v1128_v23 }
 0x2c2   : > { %v1069_v25 = vadd.f32 %v1039_v32, %v475_v46  ;;  %1336 = vmatmul.mubr.bf16.vlgmr.msra.gmra.mrb[16].mxu1 %v1127_v35  ;;  %v1083_v19 = vmax.f32 %v1067_v29, 0.0 }
 0x2c3   : > { %v1070_v27 = vadd.f32 %v1041_v24, %v476_v48  ;;  %v1084_v42 = vmax.f32 %v1068_v34, 0.0 }
 0x2c4   : > { %v1085_v22 = vmax.f32 %v1069_v25, 0.0 }
 0x2c5   : > { %v1086_v49 = vmax.f32 %v1070_v27, 0.0  ;;  %v1044_v30 = vpop.f32.mrb[24].mxu0 }
 0x2c6   : > { %v1045_v36 = vadd.f32 %v1044_v30, %v2424_v38  ;;  %v1046_v37 = vpop.f32.mrb[25].mxu0  ;;  %v1129_v40 = vpack.c.bf16 %v1085_v22, %v1083_v19 }
 0x2c7   : > { %v1047_v47 = vadd.f32 %v1046_v37, %v2427_v39  ;;  %v1048_v41 = vpop.f32.mrb[26].mxu0  ;;  %v1130_v44 = vpack.c.bf16 %v1086_v49, %v1084_v42 }
 0x2c8   : > { %v1071_v43 = vadd.f32 %v1045_v36, %v477_v63  ;;  %v1049_v46 = vadd.f32 %v1048_v41, %v2424_v38  ;;  %v1050_v45 = vpop.f32.mrb[27].mxu0 }
 0x2c9   : > { %v1072_v48 = vadd.f32 %v1047_v47, %v478_v61  ;;  %v1051_v50 = vadd.f32 %v1050_v45, %v2427_v39  ;;  %1345 = vmatprep.mubr.bf16.mxu1 %v1130_v44 }
 0x2ca   : > { %v1073_v51 = vadd.f32 %v1049_v46, %v479_v60  ;;  %1346 = vmatmul.mubr.bf16.gmra.mrb[20].mxu1 %v1129_v40  ;;  %v1087_v53 = vmax.f32 %v1071_v43, 0.0 }
 0x2cb   : > { %v1074_v52 = vadd.f32 %v1051_v50, %v480_v62  ;;  %v1088_v56 = vmax.f32 %v1072_v48, 0.0 }
 0x2cc   : > { %v1089_v55 = vmax.f32 %v1073_v51, 0.0 }
 0x2cd   : > { %v1090_v63 = vmax.f32 %v1074_v52, 0.0  ;;  %v1054_v58 = vpop.f32.mrb[28].mxu0 }
 0x2ce   : > { %v1055_v0 = vadd.f32 %v1054_v58, %v2424_v38  ;;  %v1056_v1 = vpop.f32.mrb[29].mxu0  ;;  %v1131_v54 = vpack.c.bf16 %v1089_v55, %v1087_v53 }
 0x2cf   : > { %v1057_v61 = vadd.f32 %v1056_v1, %v2427_v39  ;;  %v1058_v2 = vpop.f32.mrb[30].mxu0  ;;  %v1132_v3 = vpack.c.bf16 %v1090_v63, %v1088_v56 }
 0x2d0   : > { %v1075_v57 = vadd.f32 %v1055_v0, %v481_v13  ;;  %v1059_v60 = vadd.f32 %v1058_v2, %v2424_v38  ;;  %v1060_v59 = vpop.f32.mrb[31].mxu0 }
 0x2d1   : > { %v1076_v62 = vadd.f32 %v1057_v61, %v482_v11  ;;  %v1061_v5 = vadd.f32 %v1060_v59, %v2427_v39  ;;  %1355 = vmatprep.mubr.bf16.mxu1 %v1132_v3  ;;  %v2479_v11 = vrot.slane %v2227_v21, %v1137_v4 }
 0x2d2   : > { %v1077_v8 = vadd.f32 %v1059_v60, %v483_v10  ;;  %1356 = vmatmul.mubr.bf16.gmra.mrb[24].mxu1 %v1131_v54  ;;  %v1091_v15 = vmax.f32 %v1075_v57, 0.0 }
 0x2d3   : > { %v1078_v14 = vadd.f32 %v1061_v5, %v484_v12  ;;  %v1092_v6 = vmax.f32 %v1076_v62, 0.0 }
 0x2d4   : > { %v1093_v28 = vmax.f32 %v1077_v8, 0.0 }
 0x2d5   : > { %v1094_v13 = vmax.f32 %v1078_v14, 0.0 }
 0x2d6   : > { %v1133_v35 = vpack.c.bf16 %v1093_v28, %v1091_v15 }
 0x2d7   : > { %v1134_v38 = vpack.c.bf16 %v1094_v13, %v1092_v6 }
 0x2d9   : > { %1365 = vmatprep.mubr.bf16.mxu1 %v1134_v38 }
 0x2da   : > { %1366 = vmatmul.mubr.bf16.gmra.mrb[28].mxu1 %v1133_v35 }
 0x395   : > { %v1337_v10 = vpop.f32.mrb[16].mxu1 }
 0x396   : > { %v1338_v9 = vadd.f32 %v1337_v10, %v2479_v11  ;;  %v1339_v12 = vpop.f32.mrb[17].mxu1 }
 0x397   : > { %v1340_v39 = vadd.f32 %v1339_v12, %v2482_v7  ;;  %v1341_v16 = vpop.f32.mrb[18].mxu1 }
 0x398   : > { %v1376_v17 = vsub.f32 0.0, %v1338_v9  ;;  %v1342_v26 = vadd.f32 %v1341_v16, %v2479_v11  ;;  %v1343_v33 = vpop.f32.mrb[19].mxu1 }
 0x399   : > { %v1377_v23 = vsub.f32 0.0, %v1340_v39  ;;  %v1344_v18 = vadd.f32 %v1343_v33, %v2482_v7 }
 0x39a   : > { %v1392_v29 = vmul.f32 1.442695, %v1376_v17  ;;  %v1378_v21 = vsub.f32 0.0, %v1342_v26 }
 0x39b   : > { %v1394_v32 = vmul.f32 1.442695, %v1377_v23  ;;  %v1379_v31 = vsub.f32 0.0, %v1344_v18 }
 0x39c   : > { %1856 = vpow2.f32 %v1392_v29  ;;  %v1396_v20 = vmul.f32 1.442695, %v1378_v21 }
 0x39d   : > { %1858 = vpow2.f32 %v1394_v32  ;;  %v1398_v34 = vmul.f32 1.442695, %v1379_v31  ;;  %v1347_v24 = vpop.f32.mrb[20].mxu1 }
 0x39e   : > { %1860 = vpow2.f32 %v1396_v20  ;;  %v1348_v25 = vadd.f32 %v1347_v24, %v2479_v11  ;;  %v1349_v27 = vpop.f32.mrb[21].mxu1 }
 0x39f   : > { %1862 = vpow2.f32 %v1398_v34  ;;  %v1350_v19 = vadd.f32 %v1349_v27, %v2482_v7  ;;  %v1351_v22 = vpop.f32.mrb[22].mxu1 }
 0x3a0   : > { %v1380_v42 = vsub.f32 0.0, %v1348_v25  ;;  %v1352_v49 = vadd.f32 %v1351_v22, %v2479_v11  ;;  %v1353_v30 = vpop.f32.mrb[23].mxu1 }
 0x3a1   : > { %v1381_v36 = vsub.f32 0.0, %v1350_v19  ;;  %v1354_v37 = vadd.f32 %v1353_v30, %v2482_v7 }
 0x3a2   : > { %v1400_v40 = vmul.f32 1.442695, %v1380_v42  ;;  %v1382_v47 = vsub.f32 0.0, %v1352_v49 }
 0x3a3   : > { %v1402_v41 = vmul.f32 1.442695, %v1381_v36  ;;  %v1383_v44 = vsub.f32 0.0, %v1354_v37 }
 0x3a4   : > { %1864 = vpow2.f32 %v1400_v40  ;;  %v1404_v43 = vmul.f32 1.442695, %v1382_v47 }
 0x3a5   : > { %1866 = vpow2.f32 %v1402_v41  ;;  %v1406_v46 = vmul.f32 1.442695, %v1383_v44  ;;  %v1357_v45 = vpop.f32.mrb[24].mxu1 }
 0x3a6   : > { %v1857_v48 = vpop.eup %1856  ;;  %1868 = vpow2.f32 %v1404_v43  ;;  %v1358_v50 = vadd.f32 %v1357_v45, %v2479_v11  ;;  %v1359_v51 = vpop.f32.mrb[25].mxu1 }
 0x3a7   : > { %v1859_v52 = vpop.eup %1858  ;;  %v1424_v53 = vadd.f32 1.0, %v1857_v48  ;;  %1870 = vpow2.f32 %v1406_v46  ;;  %v1360_v55 = vadd.f32 %v1359_v51, %v2482_v7  ;;  %v1361_v56 = vpop.f32.mrb[26].mxu1 }
 0x3a8   : > { %v1861_v63 = vpop.eup %1860  ;;  %v1425_v58 = vadd.f32 1.0, %v1859_v52  ;;  %v1384_v0 = vsub.f32 0.0, %v1358_v50  ;;  %v1362_v1 = vadd.f32 %v1361_v56, %v2479_v11  ;;  %v1363_v54 = vpop.f32.mrb[27].mxu1 }
 0x3a9   : > { %v1863_v61 = vpop.eup %1862  ;;  %1872 = vrcp.f32 %v1424_v53  ;;  %v1426_v2 = vadd.f32 1.0, %v1861_v63  ;;  %v1385_v3 = vsub.f32 0.0, %v1360_v55  ;;  %v1364_v57 = vadd.f32 %v1363_v54, %v2482_v7 }
 0x3aa   : > { %1874 = vrcp.f32 %v1425_v58  ;;  %v1427_v60 = vadd.f32 1.0, %v1863_v61  ;;  %v1408_v59 = vmul.f32 1.442695, %v1384_v0  ;;  %v1386_v62 = vsub.f32 0.0, %v1362_v1 }
 0x3ab   : > { %1876 = vrcp.f32 %v1426_v2  ;;  %v1410_v5 = vmul.f32 1.442695, %v1385_v3  ;;  %v1387_v8 = vsub.f32 0.0, %v1364_v57 }
 0x3ac   : > { %1878 = vrcp.f32 %v1427_v60  ;;  %v1412_v14 = vmul.f32 1.442695, %v1386_v62 }
 0x3ad   : > { %1880 = vpow2.f32 %v1408_v59  ;;  %v1414_v15 = vmul.f32 1.442695, %v1387_v8  ;;  %v1367_v28 = vpop.f32.mrb[28].mxu1 }
 0x3ae   : > { %v1865_v6 = vpop.eup %1864  ;;  %1882 = vpow2.f32 %v1410_v5  ;;  %v1368_v13 = vadd.f32 %v1367_v28, %v2479_v11  ;;  %v1369_v35 = vpop.f32.mrb[29].mxu1 }
 0x3af   : > { %v1867_v38 = vpop.eup %1866  ;;  %v1428_v4 = vadd.f32 1.0, %v1865_v6  ;;  %1884 = vpow2.f32 %v1412_v14  ;;  %v1370_v10 = vadd.f32 %v1369_v35, %v2482_v7  ;;  %v1371_v9 = vpop.f32.mrb[30].mxu1 }
 0x3b0   : > { %v1869_v12 = vpop.eup %1868  ;;  %v1429_v39 = vadd.f32 1.0, %v1867_v38  ;;  %1886 = vpow2.f32 %v1414_v15  ;;  %v1388_v16 = vsub.f32 0.0, %v1368_v13  ;;  %v1372_v17 = vadd.f32 %v1371_v9, %v2479_v11  ;;  %v1373_v26 = vpop.f32.mrb[31].mxu1 }
 0x3b1   : > { %v1871_v33 = vpop.eup %1870  ;;  %1888 = vrcp.f32 %v1428_v4  ;;  %v1430_v23 = vadd.f32 1.0, %v1869_v12  ;;  %v1389_v18 = vsub.f32 0.0, %v1370_v10  ;;  %v1374_v29 = vadd.f32 %v1373_v26, %v2482_v7 }
 0x3b2   : > { %1890 = vrcp.f32 %v1429_v39  ;;  %v1431_v21 = vadd.f32 1.0, %v1871_v33  ;;  %v1416_v32 = vmul.f32 1.442695, %v1388_v16  ;;  %v1390_v31 = vsub.f32 0.0, %v1372_v17 }
 0x3b3   : > { %v1873_v11 = vpop.eup %1872  ;;  %1892 = vrcp.f32 %v1430_v23  ;;  %v1418_v20 = vmul.f32 1.442695, %v1389_v18  ;;  %v1391_v34 = vsub.f32 0.0, %v1374_v29 }
 0x3b4   : > { %v1875_v24 = vpop.eup %1874  ;;  %1472 = vst [vmem:[%s2503_s16] sm:$0xff] %v1873_v11  ;;  %1894 = vrcp.f32 %v1431_v21  ;;  %v1420_v25 = vmul.f32 1.442695, %v1390_v31 }
 0x3b5   : > { %v1877_v27 = vpop.eup %1876  ;;  %1473 = vst [vmem:[%s2503_s16 + $0x8] sm:$0xff] %v1875_v24  ;;  %1896 = vpow2.f32 %v1416_v32  ;;  %v1422_v19 = vmul.f32 1.442695, %v1391_v34 }
 0x3b6   : > { %v1879_v22 = vpop.eup %1878  ;;  %1474 = vst [vmem:[%s2503_s16 + $0x10] sm:$0xff] %v1877_v27  ;;  %1898 = vpow2.f32 %v1418_v20 }
 0x3b7   : > { %v1881_v7 = vpop.eup %1880  ;;  %1475 = vst [vmem:[%s2503_s16 + $0x18] sm:$0xff] %v1879_v22  ;;  %1900 = vpow2.f32 %v1420_v25 }
 0x3b8   : > { %v1883_v42 = vpop.eup %1882  ;;  %v1432_v49 = vadd.f32 1.0, %v1881_v7  ;;  %1902 = vpow2.f32 %v1422_v19 }
 0x3b9   : > { %v1885_v30 = vpop.eup %1884  ;;  %v1433_v36 = vadd.f32 1.0, %v1883_v42 }
 0x3ba   : > { %v1887_v37 = vpop.eup %1886  ;;  %1904 = vrcp.f32 %v1432_v49  ;;  %v1434_v40 = vadd.f32 1.0, %v1885_v30 }
 0x3bb   : > { %v1889_v47 = vpop.eup %1888  ;;  %1906 = vrcp.f32 %v1433_v36  ;;  %v1435_v41 = vadd.f32 1.0, %v1887_v37 }
 0x3bc   : > { %v1891_v44 = vpop.eup %1890  ;;  %1476 = vst [vmem:[%s2503_s16 + $0x20] sm:$0xff] %v1889_v47  ;;  %1908 = vrcp.f32 %v1434_v40 }
 0x3bd   : > { %v1893_v43 = vpop.eup %1892  ;;  %1477 = vst [vmem:[%s2503_s16 + $0x28] sm:$0xff] %v1891_v44  ;;  %1910 = vrcp.f32 %v1435_v41 }
 0x3be   : > { %v1895_v46 = vpop.eup %1894  ;;  %1478 = vst [vmem:[%s2503_s16 + $0x30] sm:$0xff] %v1893_v43 }
 0x3bf   : > { %v1897_v45 = vpop.eup %1896  ;;  %1479 = vst [vmem:[%s2503_s16 + $0x38] sm:$0xff] %v1895_v46 }
 0x3c0   : > { %v1899_v48 = vpop.eup %1898  ;;  %v1436_v50 = vadd.f32 1.0, %v1897_v45 }
 0x3c1   : > { %v1901_v51 = vpop.eup %1900  ;;  %v1437_v52 = vadd.f32 1.0, %v1899_v48 }
 0x3c2   : > { %v1903_v53 = vpop.eup %1902  ;;  %1912 = vrcp.f32 %v1436_v50  ;;  %v1438_v55 = vadd.f32 1.0, %v1901_v51 }
 0x3c3   : > { %1914 = vrcp.f32 %v1437_v52  ;;  %v1439_v56 = vadd.f32 1.0, %v1903_v53 }
 0x3c4   : > { %v1905_v63 = vpop.eup %1904  ;;  %1916 = vrcp.f32 %v1438_v55 }
 0x3c5   : > { %v1907_v58 = vpop.eup %1906  ;;  %1480 = vst [vmem:[%s2503_s16 + $0x40] sm:$0xff] %v1905_v63  ;;  %1918 = vrcp.f32 %v1439_v56 }
 0x3c6   : > { %v1909_v0 = vpop.eup %1908  ;;  %1481 = vst [vmem:[%s2503_s16 + $0x48] sm:$0xff] %v1907_v58 }
 0x3c7   : > { %v1911_v1 = vpop.eup %1910  ;;  %1482 = vst [vmem:[%s2503_s16 + $0x50] sm:$0xff] %v1909_v0 }
 0x3c8   : > { %1483 = vst [vmem:[%s2503_s16 + $0x58] sm:$0xff] %v1911_v1 }
 0x3cc   : > { %v1913_v54 = vpop.eup %1912 }
 0x3cd   : > { %v1915_v61 = vpop.eup %1914  ;;  %1484 = vst [vmem:[%s2503_s16 + $0x60] sm:$0xff] %v1913_v54 }
 0x3ce   : > { %v1917_v2 = vpop.eup %1916  ;;  %1485 = vst [vmem:[%s2503_s16 + $0x68] sm:$0xff] %v1915_v61 }
 0x3cf   : > { %v1919_v3 = vpop.eup %1918  ;;  %1486 = vst [vmem:[%s2503_s16 + $0x70] sm:$0xff] %v1917_v2 }
 0x3d0   : > { %1487 = vst [vmem:[%s2503_s16 + $0x78] sm:$0xff] %v1919_v3 }
 0x3d1 PF: > { %s16_s21 = sadd.s32 1, %s1926_s21  }
 0x3d2   : > { %p13_p4 = scmp.ge.s32.totalorder %s16_s21, 4  }
 0x3d4   :  { %15 = sbr.rel (!%p13_p4) target bundleno = 1 (0x1), region = 74 }

</bundles_post_ra>
